<compile_context>
chip_gen: v6e
topology: v6e:2x2x1
jax: 0.10.0
libtpu: 0.0.40
codegen_flags: <defaults>
</compile_context>

<pallas_src>
import jax
import jax.numpy as jnp
from jax.experimental import pallas as pl
from jax.experimental.pallas import tpu as pltpu


# ----------------------------------------------------------------------------
# Fused Pallas kernel: grid axis = layer index
# ----------------------------------------------------------------------------
def _fused_gnn_kernel(a_ref, x_ref, w_ref, b_ref, p_ref, wl_ref, bl_ref,
                      o_ref, h_ref):
    """One grid step == one GNN layer; last step also does pool + head Linear.

    a_ref : (Npad, Npad)  bf16   normalized adjacency (resident, constant idx)
    x_ref : (Npad, Cpad)  f32    input node features (used only at layer 0)
    w_ref : (1, Cpad, Cpad) bf16 BN-folded conv weight of this layer
    b_ref : (1, 1, Cpad)  f32    BN-folded conv bias of this layer
    p_ref : (Gpad, Npad)  f32    mean-pool matrix
    wl_ref: (Cpad, 128)   f32    head Linear weight (lane-padded)
    bl_ref: (1, 128)      f32    head Linear bias   (lane-padded)
    o_ref : (Gpad, 128)   f32    output (only column 0 / first G rows are real)
    h_ref : (Npad, Cpad)  f32    VMEM scratch carrying activations across layers
    """
    layer = pl.program_id(0)
    num_layers = pl.num_programs(0)

    @pl.when(layer == 0)
    def _init():
        h_ref[...] = x_ref[...]

    # Message passing / aggregation: (Npad, Npad) @ (Npad, Cpad), bf16 in, f32 acc.
    agg = jnp.dot(a_ref[...], h_ref[...].astype(jnp.bfloat16),
                  preferred_element_type=jnp.float32)
    # Feature transform with BatchNorm folded in: (Npad, Cpad) @ (Cpad, Cpad) + b.
    y = jnp.dot(agg.astype(jnp.bfloat16), w_ref[0],
                preferred_element_type=jnp.float32) + b_ref[0]
    # leaky_relu (default negative_slope = 0.01); dropout is identity in eval mode.
    h_ref[...] = jnp.where(y > 0, y, 0.01 * y)

    @pl.when(layer == num_layers - 1)
    def _finalize():
        # global_mean_pool then Linear(out_channels, 1); pool first is cheaper
        # since Gpad << Npad, and the head weight is lane-padded so the final
        # store is a full-width (Gpad, 128) unmasked store.
        pooled = jnp.dot(p_ref[...], h_ref[...],
                         preferred_element_type=jnp.float32)
        o_ref[...] = jnp.dot(pooled, wl_ref[...],
                             preferred_element_type=jnp.float32) + bl_ref[...]


@jax.jit
def base_gnn_forward(a_hat, x_pad, w_stack, b_stack, pool_mat, wl, bl):
    num_layers, c_pad, _ = w_stack.shape
    n_pad = a_hat.shape[0]
    g_pad = pool_mat.shape[0]
    lin_pad = wl.shape[1]
    return pl.pallas_call(
        _fused_gnn_kernel,
        out_shape=jax.ShapeDtypeStruct((g_pad, lin_pad), jnp.float32),
        grid=(num_layers,),
        in_specs=[
            pl.BlockSpec((n_pad, n_pad), lambda l: (0, 0)),       # A_hat (resident)
            pl.BlockSpec((n_pad, c_pad), lambda l: (0, 0)),       # x0
            pl.BlockSpec((1, c_pad, c_pad), lambda l: (l, 0, 0)), # per-layer W
            pl.BlockSpec((1, 1, c_pad), lambda l: (l, 0, 0)),     # per-layer b
            pl.BlockSpec((g_pad, n_pad), lambda l: (0, 0)),       # pool matrix
            pl.BlockSpec((c_pad, lin_pad), lambda l: (0, 0)),     # head weight
            pl.BlockSpec((1, lin_pad), lambda l: (0, 0)),         # head bias
        ],
        out_specs=pl.BlockSpec((g_pad, lin_pad), lambda l: (0, 0)),
        scratch_shapes=[pltpu.VMEM((n_pad, c_pad), jnp.float32)],
        compiler_params=pltpu.CompilerParams(
            dimension_semantics=("arbitrary",),     # layers are sequential (h carry)
            vmem_limit_bytes=32 * 1024 * 1024,      # explicit; safe on v5e/v6e/v7x
        ),
    )(a_hat, x_pad, w_stack, b_stack, pool_mat, wl, bl)


# ----------------------------------------------------------------------------
# Host-side parameter / graph preparation (plain JAX)
# ----------------------------------------------------------------------------
def kaiming_uniform(key, shape, fan_in):
    # nn.init.kaiming_uniform_ with nonlinearity='relu': bound = sqrt(6 / fan_in)
    bound = jnp.sqrt(6.0 / fan_in)
    return jax.random.uniform(key, shape, jnp.float32, -bound, bound)


def init_packed_params(key, in_channels, hidden_channels, out_channels,
                       num_layers, c_pad, lin_pad=128):
    """Build BN-folded, zero-padded, layer-stacked parameters."""
    dims = [in_channels] + [hidden_channels] * (num_layers - 1) + [out_channels]
    keys = jax.random.split(key, num_layers + 1)
    eps = 1e-5
    w_stack = jnp.zeros((num_layers, c_pad, c_pad), jnp.float32)
    b_stack = jnp.zeros((num_layers, 1, c_pad), jnp.float32)
    for i in range(num_layers):
        cin, cout = dims[i], dims[i + 1]
        w = kaiming_uniform(keys[i], (cin, cout), fan_in=cin)
        b = jnp.zeros((cout,), jnp.float32)
        # BatchNorm1d (eval) at init: gamma=1, beta=0, running_mean=0, running_var=1.
        scale = jnp.full((cout,), 1.0 / jnp.sqrt(1.0 + eps), jnp.float32)
        shift = jnp.zeros((cout,), jnp.float32)
        w_stack = w_stack.at[i, :cin, :cout].set(w * scale[None, :])
        b_stack = b_stack.at[i, 0, :cout].set(b * scale + shift)
    # lin1: torch Linear(out_channels, 1) -> weight (1, out_channels), zero bias.
    w_lin = kaiming_uniform(keys[-1], (1, out_channels), fan_in=out_channels)
    b_lin = jnp.zeros((1,), jnp.float32)
    wl = jnp.zeros((c_pad, lin_pad), jnp.float32).at[:out_channels, 0].set(w_lin[0])
    bl = jnp.zeros((1, lin_pad), jnp.float32).at[0, 0].set(b_lin[0])
    return w_stack.astype(jnp.bfloat16), b_stack, wl, bl


def build_normalized_adjacency(edge_index, num_nodes, n_pad):
    """A_hat = D^-1/2 (A + I) D^-1/2, zero-padded to (n_pad, n_pad), bf16."""
    src, dst = edge_index[0], edge_index[1]
    a = jnp.zeros((num_nodes, num_nodes), jnp.float32)
    a = a.at[dst, src].set(1.0)
    idx = jnp.arange(num_nodes)
    a = a.at[idx, idx].set(1.0)  # add remaining self loops (no double-count)
    deg = jnp.sum(a, axis=1)
    d_inv_sqrt = jnp.where(deg > 0, 1.0 / jnp.sqrt(deg), 0.0)
    a_hat = d_inv_sqrt[:, None] * a * d_inv_sqrt[None, :]
    a_pad = jnp.zeros((n_pad, n_pad), jnp.float32).at[:num_nodes, :num_nodes].set(a_hat)
    return a_pad.astype(jnp.bfloat16)


def build_mean_pool_matrix(batch, num_graphs, num_nodes, g_pad, n_pad):
    one_hot = (batch[None, :] == jnp.arange(num_graphs)[:, None]).astype(jnp.float32)
    counts = jnp.maximum(jnp.sum(one_hot, axis=1, keepdims=True), 1.0)
    p = one_hot / counts
    return jnp.zeros((g_pad, n_pad), jnp.float32).at[:num_graphs, :num_nodes].set(p)


def pad_features(x, n_pad, c_pad):
    n, c = x.shape
    return jnp.zeros((n_pad, c_pad), jnp.float32).at[:n, :c].set(x.astype(jnp.float32))


# ----------------------------------------------------------------------------
# Demo
# ----------------------------------------------------------------------------
if __name__ == "__main__":
    key = jax.random.PRNGKey(0)
    k_param, k_x, k_edge = jax.random.split(key, 3)

    # Small synthetic graph batch: 2 graphs, 16 nodes each.
    num_nodes = 32
    num_graphs = 2
    in_channels = 4
    hidden_channels = 32
    out_channels = 16
    num_layers = 3
    num_edges = 64

    # Padded (lane-dense) sizes.
    N_PAD = 128   # node dim padded to 128
    C_PAD = 128   # channel dim padded to 128
    G_PAD = 8     # graph dim padded to sublane multiple
    LIN_PAD = 128 # head-output lane pad

    x = jax.random.normal(k_x, (num_nodes, in_channels), jnp.float32)

    # Random directed edges within each graph.
    half = num_nodes // num_graphs
    e_keys = jax.random.split(k_edge, 2)
    src0 = jax.random.randint(e_keys[0], (num_edges // 2,), 0, half)
    dst0 = jax.random.randint(e_keys[1], (num_edges // 2,), 0, half)
    src = jnp.concatenate([src0, src0 + half])
    dst = jnp.concatenate([dst0, dst0 + half])
    edge_index = jnp.stack([src, dst], axis=0)

    batch = jnp.concatenate(
        [jnp.zeros((half,), jnp.int32), jnp.ones((num_nodes - half,), jnp.int32)]
    )

    # Prep (host-side, plain JAX).
    w_stack, b_stack, wl, bl = init_packed_params(
        k_param, in_channels, hidden_channels, out_channels, num_layers, C_PAD, LIN_PAD
    )
    a_hat = build_normalized_adjacency(edge_index, num_nodes, N_PAD)
    pool_mat = build_mean_pool_matrix(batch, num_graphs, num_nodes, G_PAD, N_PAD)
    x_pad = pad_features(x, N_PAD, C_PAD)

    out_full = base_gnn_forward(a_hat, x_pad, w_stack, b_stack, pool_mat, wl, bl)
    out_full = jax.block_until_ready(out_full)
    out = out_full[:num_graphs, :1]

    assert out.shape == (num_graphs, 1), out.shape
    assert out.dtype == jnp.float32, out.dtype
    assert bool(jnp.all(jnp.isfinite(out))), out
    print("KERNEL_OK")
</pallas_src>

<mosaic_0001>
module attributes {stable_mosaic.version = 11 : i64} {
  func.func @_fused_gnn_kernel(%arg0: i32, %arg1: memref<128x128xbf16, #tpu.memory_space<vmem>>, %arg2: memref<128x128xf32, #tpu.memory_space<vmem>>, %arg3: memref<1x128x128xbf16, #tpu.memory_space<vmem>>, %arg4: memref<1x1x128xf32, #tpu.memory_space<vmem>>, %arg5: memref<8x128xf32, #tpu.memory_space<vmem>>, %arg6: memref<128x128xf32, #tpu.memory_space<vmem>>, %arg7: memref<1x128xf32, #tpu.memory_space<vmem>>, %arg8: memref<8x128xf32, #tpu.memory_space<vmem>>, %arg9: memref<128x128xf32, #tpu.memory_space<vmem>>) attributes {dimension_semantics = [#tpu.dimension_semantics<arbitrary>], iteration_bounds = array<i64: 3>, scalar_prefetch = 0 : i64, scratch_operands = 1 : i64, tpu.core_type = #tpu.core_type<tc>, window_params = [{pipeline_mode = #tpu.pipeline_mode<synchronous>, transform_indices = @transform_0, window_bounds = array<i64: 128, 128>}, {pipeline_mode = #tpu.pipeline_mode<synchronous>, transform_indices = @transform_1, window_bounds = array<i64: 128, 128>}, {transform_indices = @transform_2, window_bounds = array<i64: 1, 128, 128>}, {transform_indices = @transform_3, window_bounds = array<i64: 1, 1, 128>}, {pipeline_mode = #tpu.pipeline_mode<synchronous>, transform_indices = @transform_4, window_bounds = array<i64: 8, 128>}, {pipeline_mode = #tpu.pipeline_mode<synchronous>, transform_indices = @transform_5, window_bounds = array<i64: 128, 128>}, {pipeline_mode = #tpu.pipeline_mode<synchronous>, transform_indices = @transform_6, window_bounds = array<i64: 1, 128>}, {pipeline_mode = #tpu.pipeline_mode<synchronous>, transform_indices = @transform_7, window_bounds = array<i64: 8, 128>}]} {
    %c0_i32 = arith.constant 0 : i32
    %0 = arith.cmpi eq, %arg0, %c0_i32 : i32
    %1 = arith.extui %0 : i1 to i32
    %c0_i32_0 = arith.constant 0 : i32
    %2 = arith.cmpi ne, %1, %c0_i32_0 : i32
    scf.if %2 {
      %c0_16 = arith.constant 0 : index
      %c0_17 = arith.constant 0 : index
      %24 = vector.load %arg2[%c0_16, %c0_17] : memref<128x128xf32, #tpu.memory_space<vmem>>, vector<128x128xf32>
      %c0_18 = arith.constant 0 : index
      %c0_19 = arith.constant 0 : index
      %25 = vector.load %arg9[%c0_18, %c0_19] : memref<128x128xf32, #tpu.memory_space<vmem>>, vector<128x128xf32>
      tpu.vector_store %arg9[%c0_18, %c0_19], %24 {strides = array<i32>} : memref<128x128xf32, #tpu.memory_space<vmem>>, vector<128x128xf32>,
    } else {
    }
    %c0 = arith.constant 0 : index
    %c0_1 = arith.constant 0 : index
    %3 = vector.load %arg1[%c0, %c0_1] : memref<128x128xbf16, #tpu.memory_space<vmem>>, vector<128x128xbf16>
    %c0_2 = arith.constant 0 : index
    %c0_3 = arith.constant 0 : index
    %4 = vector.load %arg9[%c0_2, %c0_3] : memref<128x128xf32, #tpu.memory_space<vmem>>, vector<128x128xf32>
    %5 = arith.truncf %4 : vector<128x128xf32> to vector<128x128xbf16>
    %cst = arith.constant dense<0.000000e+00> : vector<128x128xf32>
    %6 = tpu.matmul %3, %5, %cst {dimension_numbers = #tpu.dot_dimension_numbers<[1], [0], [0], [1], [0, 0, 1, 1], [], []>} : vector<128x128xbf16>, vector<128x128xbf16>, vector<128x128xf32> -> vector<128x128xf32>
    %7 = arith.truncf %6 : vector<128x128xf32> to vector<128x128xbf16>
    %c0_4 = arith.constant 0 : index
    %c0_5 = arith.constant 0 : index
    %c0_6 = arith.constant 0 : index
    %8 = vector.load %arg3[%c0_4, %c0_5, %c0_6] : memref<1x128x128xbf16, #tpu.memory_space<vmem>>, vector<1x128x128xbf16>
    %9 = vector.shape_cast %8 : vector<1x128x128xbf16> to vector<128x128xbf16>
    %cst_7 = arith.constant dense<0.000000e+00> : vector<128x128xf32>
    %10 = tpu.matmul %7, %9, %cst_7 {dimension_numbers = #tpu.dot_dimension_numbers<[1], [0], [0], [1], [0, 0, 1, 1], [], []>} : vector<128x128xbf16>, vector<128x128xbf16>, vector<128x128xf32> -> vector<128x128xf32>
    %c0_8 = arith.constant 0 : index
    %c0_9 = arith.constant 0 : index
    %c0_10 = arith.constant 0 : index
    %11 = vector.load %arg4[%c0_8, %c0_9, %c0_10] : memref<1x1x128xf32, #tpu.memory_space<vmem>>, vector<1x1x128xf32>
    %12 = vector.shape_cast %11 : vector<1x1x128xf32> to vector<1x128xf32>
    %13 = vector.broadcast %12 : vector<1x128xf32> to vector<128x128xf32>
    %14 = arith.addf %10, %13 : vector<128x128xf32>
    %cst_11 = arith.constant 0.000000e+00 : f32
    %15 = vector.broadcast %cst_11 : f32 to vector<128x128xf32>
    %16 = arith.cmpf ogt, %14, %15 : vector<128x128xf32>
    %cst_12 = arith.constant 0.00999999977 : f32
    %17 = vector.broadcast %cst_12 : f32 to vector<128x128xf32>
    %18 = arith.mulf %17, %14 : vector<128x128xf32>
    %19 = arith.select %16, %14, %18 : vector<128x128xi1>, vector<128x128xf32>
    %c0_13 = arith.constant 0 : index
    %c0_14 = arith.constant 0 : index
    %20 = vector.load %arg9[%c0_13, %c0_14] : memref<128x128xf32, #tpu.memory_space<vmem>>, vector<128x128xf32>
    tpu.vector_store %arg9[%c0_13, %c0_14], %19 {strides = array<i32>} : memref<128x128xf32, #tpu.memory_space<vmem>>, vector<128x128xf32>,
    %c2_i32 = arith.constant 2 : i32
    %21 = arith.cmpi eq, %arg0, %c2_i32 : i32
    %22 = arith.extui %21 : i1 to i32
    %c0_i32_15 = arith.constant 0 : i32
    %23 = arith.cmpi ne, %22, %c0_i32_15 : i32
    scf.if %23 {
      %c0_16 = arith.constant 0 : index
      %c0_17 = arith.constant 0 : index
      %24 = vector.load %arg5[%c0_16, %c0_17] : memref<8x128xf32, #tpu.memory_space<vmem>>, vector<8x128xf32>
      %c0_18 = arith.constant 0 : index
      %c0_19 = arith.constant 0 : index
      %25 = vector.load %arg9[%c0_18, %c0_19] : memref<128x128xf32, #tpu.memory_space<vmem>>, vector<128x128xf32>
      %cst_20 = arith.constant dense<0.000000e+00> : vector<8x128xf32>
      %26 = tpu.matmul %24, %25, %cst_20 {dimension_numbers = #tpu.dot_dimension_numbers<[1], [0], [0], [1], [0, 0, 1, 1], [], []>} : vector<8x128xf32>, vector<128x128xf32>, vector<8x128xf32> -> vector<8x128xf32>
      %c0_21 = arith.constant 0 : index
      %c0_22 = arith.constant 0 : index
      %27 = vector.load %arg6[%c0_21, %c0_22] : memref<128x128xf32, #tpu.memory_space<vmem>>, vector<128x128xf32>
      %cst_23 = arith.constant dense<0.000000e+00> : vector<8x128xf32>
      %28 = tpu.matmul %26, %27, %cst_23 {dimension_numbers = #tpu.dot_dimension_numbers<[1], [0], [0], [1], [0, 0, 1, 1], [], []>} : vector<8x128xf32>, vector<128x128xf32>, vector<8x128xf32> -> vector<8x128xf32>
      %c0_24 = arith.constant 0 : index
      %c0_25 = arith.constant 0 : index
      %29 = vector.load %arg7[%c0_24, %c0_25] : memref<1x128xf32, #tpu.memory_space<vmem>>, vector<1x128xf32>
      %30 = vector.broadcast %29 : vector<1x128xf32> to vector<8x128xf32>
      %31 = arith.addf %28, %30 : vector<8x128xf32>
      %c0_26 = arith.constant 0 : index
      %c0_27 = arith.constant 0 : index
      %32 = vector.load %arg8[%c0_26, %c0_27] : memref<8x128xf32, #tpu.memory_space<vmem>>, vector<8x128xf32>
      tpu.vector_store %arg8[%c0_26, %c0_27], %31 {strides = array<i32>} : memref<8x128xf32, #tpu.memory_space<vmem>>, vector<8x128xf32>,
    } else {
    }
    return
  }
  func.func @transform_0(%arg0: i32) -> (i32, i32) {
    %c0_i32 = arith.constant 0 : i32
    %c0_i32_0 = arith.constant 0 : i32
    %c0_i32_1 = arith.constant 0 : i32
    return %c0_i32, %c0_i32_0 : i32, i32
  }
  func.func @transform_1(%arg0: i32) -> (i32, i32) {
    %c0_i32 = arith.constant 0 : i32
    %c0_i32_0 = arith.constant 0 : i32
    %c0_i32_1 = arith.constant 0 : i32
    return %c0_i32, %c0_i32_0 : i32, i32
  }
  func.func @transform_2(%arg0: i32) -> (i32, i32, i32) {
    %c0_i32 = arith.constant 0 : i32
    %c0_i32_0 = arith.constant 0 : i32
    %c0_i32_1 = arith.constant 0 : i32
    return %arg0, %c0_i32, %c0_i32_0 : i32, i32, i32
  }
  func.func @transform_3(%arg0: i32) -> (i32, i32, i32) {
    %c0_i32 = arith.constant 0 : i32
    %c0_i32_0 = arith.constant 0 : i32
    %c0_i32_1 = arith.constant 0 : i32
    return %arg0, %c0_i32, %c0_i32_0 : i32, i32, i32
  }
  func.func @transform_4(%arg0: i32) -> (i32, i32) {
    %c0_i32 = arith.constant 0 : i32
    %c0_i32_0 = arith.constant 0 : i32
    %c0_i32_1 = arith.constant 0 : i32
    return %c0_i32, %c0_i32_0 : i32, i32
  }
  func.func @transform_5(%arg0: i32) -> (i32, i32) {
    %c0_i32 = arith.constant 0 : i32
    %c0_i32_0 = arith.constant 0 : i32
    %c0_i32_1 = arith.constant 0 : i32
    return %c0_i32, %c0_i32_0 : i32, i32
  }
  func.func @transform_6(%arg0: i32) -> (i32, i32) {
    %c0_i32 = arith.constant 0 : i32
    %c0_i32_0 = arith.constant 0 : i32
    %c0_i32_1 = arith.constant 0 : i32
    return %c0_i32, %c0_i32_0 : i32, i32
  }
  func.func @transform_7(%arg0: i32) -> (i32, i32) {
    %c0_i32 = arith.constant 0 : i32
    %c0_i32_0 = arith.constant 0 : i32
    %c0_i32_1 = arith.constant 0 : i32
    return %c0_i32, %c0_i32_0 : i32, i32
  }
}

</mosaic_0001>

<bundles_post_ra>
// kernel: base_gnn_forward.1
= control target key start
LH: loop header
LB: loop body
LE: loop exit
PB: predicated region body
PF: predicated region fallthrough
CT: control target
= control target key end

     0   :  { %12 = vsyncpa [#allocation4], 0  ;;  %s1986_s0 = inlined_call_operand.hbm [shape: bf16[128,128], index: 0, kind: input, shape index: {}]   ;;  %s1987_s1 = inlined_call_operand.hbm [shape: f32[128,128], index: 1, kind: input, shape index: {}]   ;;  %s1988_s2 = inlined_call_operand.hbm [shape: bf16[3,128,128], index: 2, kind: input, shape index: {}]   ;;  %s1989_s3 = inlined_call_operand.vmem [shape: f32[3,1,128], index: 3, kind: input, shape index: {}]   ;;  %s1990_s4 = inlined_call_operand.hbm [shape: f32[8,128], index: 4, kind: input, shape index: {}]   ;;  %s1991_s5 = inlined_call_operand.hbm [shape: f32[128,128], index: 5, kind: input, shape index: {}]   ;;  %s1992_s6 = inlined_call_operand.vmem [shape: f32[1,128], index: 6, kind: input, shape index: {}]   ;;  %s1993_s7 = inlined_call_operand.hbm [shape: f32[8,128], index: 7, kind: output, shape index: {}]  }
   0x1   :  { %13 = vsyncpa [#allocation7], 0 }
   0x2   :  { %14 = vsyncpa [#allocation11], 0 }
   0x3   :  { %15 = vsyncpa [#allocation5], 0  ;;  %s1718_s24 = smov 0   ;;  %s1720_s25 = smov 0  }
   0x4   :  { %s1722_s26 = smov 0   ;;  %s1724_s27 = smov 0  }
   0x5 LB: > { %s1737_s28 = sadd.s32 4294967295, %s1664_s27   ;;  %p83_p0 = scmp.ne.s32.totalorder %s1656_s25, %s1652_s24  ;;  %s1664_s27 = sphi %s1724_s27, %s2015_s27   ;;  %s1660_s26 = sphi %s1722_s26, %s2014_s26   ;;  %s1656_s25 = sphi %s1720_s25, %s2013_s25   ;;  %s1652_s24 = sphi %s1718_s24, %s2012_s24  }
   0x6   : > { %p1994_p1 = scmp.eq.s32.totalorder %s1737_s28, 0  ;;  %p1105_p2 = scmp.ge.s32.totalorder %s1664_s27, 1 }
   0x7   : > { %p204_p3 = scmp.lt.s32.totalorder %s1664_s27, 4  ;;  %s1666_s8 = smov [#allocation3]  }
   0x8   : > { %p1746_p5 = por %p1994_p1, %p83_p0  ;;  %s216_s9 = sshll.u32 %s1666_s8, 4  ;;  %s217_s9 = int_to_ptr.vmem [resolvable:$true] %s216_s9 }
   0x9   : > { %p1750_p6 = pnand %p1105_p2, %p204_p3  ;;  %s1667_s11 = smov [#allocation6]  }
   0xa   : > { %s1997_s29 = scalar_select %p1746_p5, 1, 0 }
   0xb   : > { %s1998_s30 = scalar_select %p1750_p6, 1, 0 }
   0xc   : > { %p1367_p7 = pneg %p1750_p6  ;;  %s229_s12 = sshll.u32 %s1667_s11, 4  ;;  %s230_s12 = int_to_ptr.vmem [resolvable:$true] %s229_s12 }
   0xd   : > { %s1465_s13 = scalar_lea.vmem %s217_s9, 1024  ;;  %p1473_p13 = scmp.lt.s32.totalorder %s217_s9, %s217_s9 }
   0xe   : > { %p1758_p8 = pnand %p1367_p7, %p1994_p1  ;;  %p1466_p10 = scmp.ne.s32.totalorder %s217_s9, %s1465_s13 }
   0xf   : > { %p1474_p0 = scmp.lt.s32.totalorder %s1465_s13, %s1465_s13 }
  0x10   : > { %p1456_p9 = pneg %p1758_p8 }
  0x11   : > { %p1475_p2 = por %p1474_p0, %p1473_p13 }
  0x12   : > { %p1468_p11 = pnand %p1466_p10, %p1456_p9 }
  0x14   : > { %p1469_p12 = pneg %p1468_p11 }
  0x16   : > { %p1476_p3 = pnand %p1475_p2, %p1469_p12 }
  0x18   : > { %1479 = shalt.err (!%p1476_p3)
}
  0x19   : > { %s1668_s14 = smov 64   ;;  %s1669_s15 = smov 4  }
  0x1a   : > { %1370 = dma.hbm_to_vmem [thread:$0]  (!%p1758_p8), %s1986_s0, 1024, %s217_s9, [#allocation4], %s1668_s14, %s1668_s14, %s1669_s15  }
  0x1b   : > { %s1491_s18 = scalar_lea.vmem %s230_s12, 2048  ;;  %p1499_p12 = scmp.lt.s32.totalorder %s230_s12, %s230_s12 }
  0x1c   : > { %p1492_p7 = scmp.ne.s32.totalorder %s230_s12, %s1491_s18  ;;  %p1500_p13 = scmp.lt.s32.totalorder %s1491_s18, %s1491_s18 }
  0x1e   : > { %p1494_p10 = pnand %p1492_p7, %p1456_p9  ;;  %p1501_p0 = por %p1500_p13, %p1499_p12 }
  0x20   : > { %p1495_p11 = pneg %p1494_p10 }
  0x22   : > { %p1502_p2 = pnand %p1501_p0, %p1495_p11 }
  0x24   : > { %1505 = shalt.err (!%p1502_p2)
}
  0x25   : > { %s1670_s19 = smov 128   ;;  %s1671_s20 = smov 8  }
  0x26   : > { %1373 = dma.hbm_to_vmem [thread:$0]  (!%p1758_p8), %s1987_s1, 2048, %s230_s12, [#allocation7], %s1670_s19, %s1670_s19, %s1671_s20  }
  0x27   : > { %s1672_s23 = smov [#allocation9]   ;;  %s1673_s8 = smov [#allocation10]  }
  0x28   : > { %s243_s24 = sshll.u32 %s1672_s23, 4  ;;  %s253_s9 = sshll.u32 %s1673_s8, 4  ;;  %s244_s24 = int_to_ptr.vmem [resolvable:$true] %s243_s24  ;;  %s254_s9 = int_to_ptr.vmem [resolvable:$true] %s253_s9 }
  0x29   : > { %s1517_s11 = scalar_lea.vmem %s244_s24, 128  ;;  %p1525_p11 = scmp.lt.s32.totalorder %s244_s24, %s244_s24 }
  0x2a   : > { %p1518_p3 = scmp.ne.s32.totalorder %s244_s24, %s1517_s11  ;;  %p1526_p12 = scmp.lt.s32.totalorder %s1517_s11, %s1517_s11 }
  0x2c   : > { %p1520_p7 = pnand %p1518_p3, %p1456_p9  ;;  %p1527_p13 = por %p1526_p12, %p1525_p11 }
  0x2e   : > { %p1521_p10 = pneg %p1520_p7 }
  0x30   : > { %p1528_p0 = pnand %p1527_p13, %p1521_p10 }
  0x32   : > { %1531 = shalt.err (!%p1528_p0)
}
  0x33   : > { %1376 = dma.hbm_to_vmem [thread:$0]  (!%p1758_p8), %s1990_s4, 128, %s244_s24, [#allocation7]  }
  0x34   : > { %s1543_s16 = scalar_lea.vmem %s254_s9, 2048  ;;  %p1551_p3 = scmp.lt.s32.totalorder %s254_s9, %s254_s9 }
  0x35   : > { %p1544_p2 = scmp.ne.s32.totalorder %s254_s9, %s1543_s16  ;;  %p1552_p7 = scmp.lt.s32.totalorder %s1543_s16, %s1543_s16 }
  0x37   : > { %p1546_p4 = pnand %p1544_p2, %p1456_p9  ;;  %p1553_p5 = por %p1552_p7, %p1551_p3 }
  0x39   : > { %p1547_p1 = pneg %p1546_p4 }
  0x3b   : > { %p1554_p6 = pnand %p1553_p5, %p1547_p1 }
  0x3d   : > { %1557 = shalt.err (!%p1554_p6)
}
  0x3e   : > { %1379 = dma.hbm_to_vmem [thread:$0]  (!%p1758_p8), %s1991_s5, 2048, %s254_s9, [#allocation11], %s1670_s19, %s1670_s19, %s1671_s20  }
  0x3f   : > { %s1806_s21 = sadd.s32 1, %s1664_s27   ;;  %s70_s22 = sadd.s32 1, %s1660_s26 }
  0x40   : > { %s67_s10 = ssub.s32 %s1664_s27, %s1806_s21  ;;  %p77_p4 = scmp.ne.s32.totalorder %s1660_s26, %s1656_s25 }
  0x41   : > { %p68_p1 = scmp.eq.s32.totalorder %s67_s10, 0  ;;  %p78_p5 = scmp.eq.s32.totalorder %s1664_s27, 0 }
  0x42   : > { %p1388_p9 = scmp.lt.s32.totalorder %s1664_s27, 3  ;;  %s270_s24 = sand.u32 1, %s1664_s27  }
  0x43   : > { %s1815_s23 = scalar_select %p68_p1, %s1660_s26, %s70_s22  }
  0x44   : > { %p79_p6 = por %p78_p5, %p77_p4  ;;  %s272_s8 = sand.u32 1, %s1660_s26  }
  0x45   : > { %s1111_s11 = sshll.u32 %s272_s8, 6  ;;  %s1144_s12 = sshll.u32 %s1664_s27, 10 }
  0x46   : > { %s1824_s19 = scalar_lea.hbm %s1988_s2, %s1144_s12  ;;  %s274_s20 = scalar_lea.vmem [#allocation8], %s1111_s11 }
  0x47   : > { %s281_s9 = sshll.u32 %s274_s20, 4  ;;  %p1828_p8 = pnand %p1388_p9, %p79_p6  ;;  %s1826_s9 = int_to_ptr.vmem [resolvable:$true] %s281_s9 }
  0x48   : > { %s1832_s18 = scalar_lea.sflag [#allocation4], %s270_s24  ;;  %s1558_s27 = scalar_lea.hbm %s1824_s19, 1024 }
  0x49   : > { %p1559_p10 = scmp.ne.s32.totalorder %s1824_s19, %s1558_s27  ;;  %p1560_p11 = pneg %p1828_p8 }
  0x4a   : > { %s1563_s8 = scalar_lea.hbm %s1988_s2, 3072  ;;  %p1564_p0 = scmp.lt.s32.totalorder %s1824_s19, %s1988_s2 }
  0x4b   : > { %p1561_p12 = pnand %p1560_p11, %p1559_p10  ;;  %p1565_p2 = scmp.lt.s32.totalorder %s1563_s8, %s1558_s27 }
  0x4d   : > { %p1562_p13 = pneg %p1561_p12  ;;  %p1566_p3 = por %p1565_p2, %p1564_p0 }
  0x4f   : > { %p1567_p7 = pnand %p1566_p3, %p1562_p13 }
  0x51   : > { %1570 = shalt.err (!%p1567_p7)
}
  0x52   : > { %s1571_s24 = scalar_lea.vmem %s1826_s9, 1024  ;;  %s1674_s13 = smov [#allocation8]  }
  0x53   : > { %p1572_p1 = scmp.ne.s32.totalorder %s1826_s9, %s1571_s24  ;;  %s1576_s16 = sshll.u32 %s1674_s13, 4  ;;  %s1577_s16 = int_to_ptr.vmem [resolvable:$false] %s1576_s16 }
  0x54   : > { %s1578_s20 = scalar_lea.vmem %s1577_s16, 2048  ;;  %p1579_p6 = scmp.lt.s32.totalorder %s1826_s9, %s1577_s16 }
  0x55   : > { %p1574_p4 = pnand %p1572_p1, %p1560_p11  ;;  %p1580_p9 = scmp.lt.s32.totalorder %s1578_s20, %s1571_s24 }
  0x57   : > { %p1575_p5 = pneg %p1574_p4  ;;  %p1581_p10 = por %p1580_p9, %p1579_p6 }
  0x59   : > { %p1582_p12 = pnand %p1581_p10, %p1575_p5 }
  0x5b   : > { %1585 = shalt.err (!%p1582_p12)
}
  0x5c   : > { %1383 = dma.hbm_to_vmem [thread:$0]  (!%p1828_p8), %s1824_s19, 1024, %s1826_s9, %s1832_s18, %s1668_s14, %s1668_s14, %s1669_s15  }
  0x5d   : > { %p2001_p11 = scmp.ne.s32.totalorder %s1998_s30, 0 }
  0x5e   : > { %p2002_p13 = scmp.eq.s32.totalorder (!%p2001_p11), %s1737_s28, 0 }
  0x5f   : > { %299 = sbr.rel (%p2001_p11) target bundleno = 1045 (0x415), region = 48 }
  0x64   : > { %1627 = dma.done.wait (%p2002_p13), [#allocation4], 1024   ;;  %p2003_p0 = pmov %p2002_p13 }
  0x66   : > { %1629 = vsyncadd (%p2003_p0), [#allocation4], 4294966272  ;;  %p2004_p2 = pmov %p2003_p0 }
  0x67   : > { %p2005_p3 = pmov %p2003_p0 }
  0x68   : > { %1631 = dma.done.wait (%p2004_p2), [#allocation7], 2048  }
  0x69   : > { %1633 = vsyncadd (%p2005_p3), [#allocation7], 4294965248  ;;  %s309_s17 = sand.u32 1, %s1737_s28   ;;  %s311_s14 = sand.u32 1, %s1656_s25  }
  0x6a   : > { %s1117_s15 = sshll.u32 %s311_s14, 6  ;;  %s310_s30 = scalar_lea.sflag [#allocation4], %s309_s17 }
  0x6b   : > { %s1868_s19 = scalar_lea.vmem [#allocation8], %s1117_s15  ;;  %p2006_p8 = scmp.ne.s32.totalorder %s1997_s29, 0 }
  0x6d   : > { %1635 = dma.done.wait (%p2006_p8), %s310_s30, 1024  }
  0x6e   : > { %1637 = vsyncadd (%p2006_p8), %s310_s30, 4294966272  ;;  %p2007_p7 = pmov %p2003_p0 }
  0x6f   : > { %p2008_p1 = pmov %p2003_p0 }
  0x70   : > { %1639 = dma.done.wait (%p2007_p7), [#allocation7], 128  }
  0x71   : > { %1641 = vsyncadd (%p2008_p1), [#allocation7], 4294967168  ;;  %p2009_p4 = pmov %p2003_p0 }
  0x72   : > { %p2010_p5 = pmov %p2003_p0 }
  0x73   : > { %1643 = dma.done.wait (%p2009_p4), [#allocation11], 2048  }
  0x74   : > { %1645 = vsyncadd (%p2010_p5), [#allocation11], 4294965248  ;;  %p350_p6 = scmp.lt.s32.totalorder %s1737_s28, 2  ;;  %p2011_p9 = scmp.ne.s32.totalorder %s1737_s28, 0 }
  0x76   : > { %s1884_s9 = scalar_select %p350_p6, %s1737_s28, 2 }
  0x77   : > { %357 = sbr.rel (%p2011_p9) target bundleno = 133 (0x85), region = 72 }
  0x78   : > { %s352_s27 = scalar_lea.vmem %s1989_s3, %s1884_s9 }
  0x7c   : > { %v358_v0 = vld [vmem:[#allocation6] sm:$0xff]  ;;  %v359_v1 = vld [vmem:[#allocation6 + $0x8] sm:$0xff]  ;;  %v360_v2 = vld [vmem:[#allocation6 + $0x10] sm:$0xff] }
  0x7d   : > { %374 = vst [vmem:[#allocation2 + $0x30] sm:$0xff] %v358_v0  ;;  %375 = vst [vmem:[#allocation2] sm:$0xff] %v359_v1  ;;  %v361_v3 = vld [vmem:[#allocation6 + $0x18] sm:$0xff]  ;;  %v362_v4 = vld [vmem:[#allocation6 + $0x20] sm:$0xff] }
  0x7e   : > { %376 = vst [vmem:[#allocation2 + $0x58] sm:$0xff] %v360_v2  ;;  %v363_v5 = vld [vmem:[#allocation6 + $0x28] sm:$0xff]  ;;  %377 = vst [vmem:[#allocation2 + $0x18] sm:$0xff] %v361_v3  ;;  %v364_v6 = vld [vmem:[#allocation6 + $0x30] sm:$0xff] }
  0x7f   : > { %378 = vst [vmem:[#allocation2 + $0x50] sm:$0xff] %v362_v4  ;;  %379 = vst [vmem:[#allocation2 + $0x68] sm:$0xff] %v363_v5  ;;  %v365_v7 = vld [vmem:[#allocation6 + $0x38] sm:$0xff]  ;;  %v366_v8 = vld [vmem:[#allocation6 + $0x40] sm:$0xff] }
  0x80   : > { %380 = vst [vmem:[#allocation2 + $0x8] sm:$0xff] %v364_v6  ;;  %381 = vst [vmem:[#allocation2 + $0x48] sm:$0xff] %v365_v7  ;;  %v367_v9 = vld [vmem:[#allocation6 + $0x48] sm:$0xff]  ;;  %v368_v10 = vld [vmem:[#allocation6 + $0x50] sm:$0xff] }
  0x81   : > { %382 = vst [vmem:[#allocation2 + $0x40] sm:$0xff] %v366_v8  ;;  %v369_v11 = vld [vmem:[#allocation6 + $0x58] sm:$0xff]  ;;  %383 = vst [vmem:[#allocation2 + $0x20] sm:$0xff] %v367_v9  ;;  %v370_v12 = vld [vmem:[#allocation6 + $0x60] sm:$0xff] }
  0x82   : > { %384 = vst [vmem:[#allocation2 + $0x10] sm:$0xff] %v368_v10  ;;  %385 = vst [vmem:[#allocation2 + $0x38] sm:$0xff] %v369_v11  ;;  %v371_v13 = vld [vmem:[#allocation6 + $0x68] sm:$0xff]  ;;  %v372_v14 = vld [vmem:[#allocation6 + $0x70] sm:$0xff] }
  0x83   : > { %386 = vst [vmem:[#allocation2 + $0x60] sm:$0xff] %v370_v12  ;;  %387 = vst [vmem:[#allocation2 + $0x70] sm:$0xff] %v371_v13  ;;  %v373_v15 = vld [vmem:[#allocation6 + $0x78] sm:$0xff] }
  0x84   : > { %388 = vst [vmem:[#allocation2 + $0x78] sm:$0xff] %v372_v14  ;;  %389 = vst [vmem:[#allocation2 + $0x28] sm:$0xff] %v373_v15 }
  0x85 PF: > { %v1438_v27 = vld [vmem:[#allocation3] sm:$0xff]   ;;  %v1446_v34 = vld [vmem:[%s1868_s19 + $0x38] sm:$0xff]   ;;  %v1447_v35 = vld [vmem:[%s1868_s19 + $0x30] sm:$0xff]   ;;  %p1138_p10 = scmp.ne.s32.totalorder %s1737_s28, 2 }
  0x86   : > { %1227 = vmatprep.mubr.bf16.mxu0 %v1438_v27  ;;  %v410_v31 = vld [vmem:[#allocation2 + $0x50] sm:$0xff]  ;;  %v411_v33 = vld [vmem:[#allocation2 + $0x68] sm:$0xff]  ;;  %v408_v36 = vld [vmem:[#allocation2 + $0x58] sm:$0xff]  ;;  %1243 = vmatprep.subr.bf16.mxu1 %v1446_v34 }
  0x87   : > { %v412_v29 = vld [vmem:[#allocation2 + $0x8] sm:$0xff]  ;;  %v424_v37 = vpack.c.bf16 %v411_v33, %v410_v31  ;;  %v409_v38 = vld [vmem:[#allocation2 + $0x18] sm:$0xff]  ;;  %1244 = vmatpush3.bf16.msra.mxu1 %v1446_v34  ;;  %v406_v41 = vld [vmem:[#allocation2 + $0x30] sm:$0xff] }
  0x88   : > { %v414_v24 = vld [vmem:[#allocation2 + $0x40] sm:$0xff]  ;;  %v413_v30 = vld [vmem:[#allocation2 + $0x48] sm:$0xff]  ;;  %1245 = vmatprep.subr.bf16.mxu1 %v1447_v35  ;;  %v423_v40 = vpack.c.bf16 %v409_v38, %v408_v36  ;;  %v1450_v45 = vld [vmem:[%s1868_s19 + $0x18] sm:$0xff]  }
  0x89   : > { %v416_v22 = vld [vmem:[#allocation2 + $0x10] sm:$0xff]  ;;  %v417_v23 = vld [vmem:[#allocation2 + $0x38] sm:$0xff]  ;;  %v415_v26 = vld [vmem:[#allocation2 + $0x20] sm:$0xff]  ;;  %v425_v32 = vpack.c.bf16 %v413_v30, %v412_v29 }
  0x8a   : > { %v418_v18 = vld [vmem:[#allocation2 + $0x60] sm:$0xff]  ;;  %v419_v20 = vld [vmem:[#allocation2 + $0x70] sm:$0xff]  ;;  %v427_v25 = vpack.c.bf16 %v417_v23, %v416_v22  ;;  %v426_v28 = vpack.c.bf16 %v415_v26, %v414_v24  ;;  %v1448_v39 = vld [vmem:[%s1868_s19 + $0x28] sm:$0xff]  }
  0x8b   : > { %v420_v16 = vld [vmem:[#allocation2 + $0x78] sm:$0xff]  ;;  %v421_v17 = vld [vmem:[#allocation2 + $0x28] sm:$0xff]  ;;  %v428_v21 = vpack.c.bf16 %v419_v20, %v418_v18  ;;  %1246 = vmatpush3.bf16.msra.mxu1 %v1447_v35  ;;  %v407_v42 = vld [vmem:[#allocation2] sm:$0xff] }
  0x8c   : > { %v429_v19 = vpack.c.bf16 %v421_v17, %v420_v16  ;;  %1247 = vmatprep.subr.bf16.mxu1 %v1448_v39  ;;  %v1449_v43 = vld [vmem:[%s1868_s19 + $0x20] sm:$0xff]   ;;  %v422_v44 = vpack.c.bf16 %v407_v42, %v406_v41  ;;  %v1451_v46 = vld [vmem:[%s1868_s19 + $0x10] sm:$0xff]   ;;  %v1439_v47 = vld [vmem:[#allocation3 + $0x8] sm:$0xff]  }
  0x8d   : > { %v1440_v48 = vld [vmem:[#allocation3 + $0x10] sm:$0xff]   ;;  %v1441_v49 = vld [vmem:[#allocation3 + $0x18] sm:$0xff]   ;;  %v1442_v50 = vld [vmem:[#allocation3 + $0x20] sm:$0xff]  }
  0x8e   : > { %1211 = vmatprep.subr.bf16.mxu0 %v429_v19  ;;  %v1443_v51 = vld [vmem:[#allocation3 + $0x28] sm:$0xff]   ;;  %v1444_v52 = vld [vmem:[#allocation3 + $0x30] sm:$0xff]   ;;  %v1445_v53 = vld [vmem:[#allocation3 + $0x38] sm:$0xff]  }
  0x8f   : > { %1212 = vmatpush3.bf16.msra.mxu0 %v429_v19  ;;  %1248 = vmatpush3.bf16.msra.mxu1 %v1448_v39  ;;  %v1452_v54 = vld [vmem:[%s1868_s19 + $0x8] sm:$0xff]   ;;  %v1453_v55 = vld [vmem:[%s1868_s19] sm:$0xff]  }
  0x90   : > { %1213 = vmatprep.subr.bf16.mxu0 %v428_v21  ;;  %1249 = vmatprep.subr.bf16.mxu1 %v1449_v43  ;;  %v1905_v16 = vld [vmem:[%s352_s27] ss:$0 sm:$0xff] }
  0x93   : > { %1214 = vmatpush3.bf16.msra.mxu0 %v428_v21  ;;  %1250 = vmatpush3.bf16.msra.mxu1 %v1449_v43 }
  0x94   : > { %1215 = vmatprep.subr.bf16.mxu0 %v427_v25  ;;  %1251 = vmatprep.subr.bf16.mxu1 %v1450_v45 }
  0x97   : > { %1216 = vmatpush3.bf16.msra.mxu0 %v427_v25  ;;  %1252 = vmatpush3.bf16.msra.mxu1 %v1450_v45 }
  0x98   : > { %1217 = vmatprep.subr.bf16.mxu0 %v426_v28  ;;  %1253 = vmatprep.subr.bf16.mxu1 %v1451_v46 }
  0x9b   : > { %1218 = vmatpush3.bf16.msra.mxu0 %v426_v28  ;;  %1254 = vmatpush3.bf16.msra.mxu1 %v1451_v46 }
  0x9c   : > { %1219 = vmatprep.subr.bf16.mxu0 %v425_v32  ;;  %1255 = vmatprep.subr.bf16.mxu1 %v1452_v54 }
  0x9f   : > { %1220 = vmatpush3.bf16.msra.mxu0 %v425_v32  ;;  %1256 = vmatpush3.bf16.msra.mxu1 %v1452_v54 }
  0xa0   : > { %1221 = vmatprep.subr.bf16.mxu0 %v424_v37  ;;  %1257 = vmatprep.subr.bf16.mxu1 %v1453_v55 }
  0xa3   : > { %1222 = vmatpush3.bf16.msra.mxu0 %v424_v37  ;;  %1258 = vmatpush3.bf16.msra.mxu1 %v1453_v55 }
  0xa4   : > { %1223 = vmatprep.subr.bf16.mxu0 %v423_v40 }
  0xa7   : > { %1224 = vmatpush3.bf16.msra.mxu0 %v423_v40 }
  0xa8   : > { %1225 = vmatprep.subr.bf16.mxu0 %v422_v44 }
  0xab   : > { %1226 = vmatpush3.bf16.msra.mxu0 %v422_v44 }
  0xae   : > { %1228 = vmatmul.mubr.bf16.vlgmr.msra.gmra.mxu0 %v1439_v47 }
  0xaf   : > { %1231 = vmatprep.mubr.bf16.mxu0 %v1440_v48 }
  0xb6   : > { %1232 = vmatmul.mubr.bf16.gmra.mxu0 %v1441_v49 }
  0xb7   : > { %1235 = vmatprep.mubr.bf16.mxu0 %v1442_v50 }
  0xbe   : > { %1236 = vmatmul.mubr.bf16.gmra.mxu0 %v1443_v51 }
  0xbf   : > { %1239 = vmatprep.mubr.bf16.mxu0 %v1444_v52 }
  0xc6   : > { %1240 = vmatmul.mubr.bf16.gmra.mxu0 %v1445_v53 }
 0x16e   : > { %v1229_v56 = vpop.f32.mrf.mxu0 }
 0x170   : > { %v512_v57 = vpop.f32.mrf.mxu0 }
 0x172   : > { %v1230_v58 = vpop.f32.mrf.mxu0 }
 0x173   : > { %v576_v61 = vpack.c.bf16 %v1230_v58, %v1229_v56 }
 0x174   : > { %v515_v59 = vpop.f32.mrf.mxu0 }
 0x175   : > { %v575_v60 = vpack.c.bf16 %v515_v59, %v512_v57 }
 0x176   : > { %v1233_v62 = vpop.f32.mrf.mxu0 }
 0x177   : > { %1259 = vmatprep.mubr.bf16.mxu1 %v575_v60 }
 0x178   : > { %v528_v63 = vpop.f32.mrf.mxu0  ;;  %1260 = vmatmul.mubr.bf16.vlgmr.msra.gmra.mxu1 %v576_v61 }
 0x17a   : > { %v1234_v0 = vpop.f32.mrf.mxu0 }
 0x17b   : > { %v578_v3 = vpack.c.bf16 %v1234_v0, %v1233_v62 }
 0x17c   : > { %v531_v1 = vpop.f32.mrf.mxu0 }
 0x17d   : > { %v577_v2 = vpack.c.bf16 %v531_v1, %v528_v63 }
 0x17e   : > { %v1237_v4 = vpop.f32.mrf.mxu0 }
 0x17f   : > { %1263 = vmatprep.mubr.bf16.mxu1 %v577_v2 }
 0x180   : > { %v544_v5 = vpop.f32.mrf.mxu0  ;;  %1264 = vmatmul.mubr.bf16.gmra.mxu1 %v578_v3 }
 0x182   : > { %v1238_v6 = vpop.f32.mrf.mxu0 }
 0x183   : > { %v580_v9 = vpack.c.bf16 %v1238_v6, %v1237_v4 }
 0x184   : > { %v547_v7 = vpop.f32.mrf.mxu0 }
 0x185   : > { %v579_v8 = vpack.c.bf16 %v547_v7, %v544_v5 }
 0x186   : > { %v1241_v10 = vpop.f32.mrf.mxu0 }
 0x187   : > { %1267 = vmatprep.mubr.bf16.mxu1 %v579_v8 }
 0x188   : > { %v560_v11 = vpop.f32.mrf.mxu0  ;;  %1268 = vmatmul.mubr.bf16.gmra.mxu1 %v580_v9 }
 0x18a   : > { %v1242_v12 = vpop.f32.mrf.mxu0 }
 0x18b   : > { %v582_v15 = vpack.c.bf16 %v1242_v12, %v1241_v10 }
 0x18c   : > { %v563_v13 = vpop.f32.mrf.mxu0 }
 0x18d   : > { %v581_v14 = vpack.c.bf16 %v563_v13, %v560_v11 }
 0x18f   : > { %1271 = vmatprep.mubr.bf16.mxu1 %v581_v14 }
 0x190   : > { %1272 = vmatmul.mubr.bf16.gmra.mxu1 %v582_v15 }
 0x238   : > { %v1261_v17 = vpop.f32.mrf.mxu1 }
 0x239   : > { %v697_v18 = vadd.f32 %v1261_v17, %v1905_v16 }
 0x23a   : > { %v688_v19 = vpop.f32.mrf.mxu1 }
 0x23b   : > { %vm753_vm0 = vcmp.gt.f32.partialorder %v697_v18, 0.0  ;;  %v769_v20 = vmul.f32 0.01, %v697_v18  ;;  %v689_v21 = vadd.f32 %v1905_v16, %v688_v19 }
 0x23c   : > { %v1262_v22 = vpop.f32.mrf.mxu1 }
 0x23d   : > { %v785_v23 = vsel %vm753_vm0, %v697_v18, %v769_v20  ;;  %vm751_vm1 = vcmp.gt.f32.partialorder %v689_v21, 0.0  ;;  %v767_v24 = vmul.f32 0.01, %v689_v21  ;;  %v700_v25 = vadd.f32 %v1262_v22, %v1905_v16 }
 0x23e   : > { %801 = vst [vmem:[#allocation2 + $0x58] sm:$0xff] %v785_v23  ;;  %v691_v26 = vpop.f32.mrf.mxu1 }
 0x23f   : > { %v783_v27 = vsel %vm751_vm1, %v689_v21, %v767_v24  ;;  %vm754_vm2 = vcmp.gt.f32.partialorder %v700_v25, 0.0  ;;  %v770_v28 = vmul.f32 0.01, %v700_v25  ;;  %v692_v29 = vadd.f32 %v1905_v16, %v691_v26 }
 0x240   : > { %799 = vst [vmem:[#allocation2 + $0x30] sm:$0xff] %v783_v27  ;;  %v1265_v30 = vpop.f32.mrf.mxu1 }
 0x241   : > { %v786_v31 = vsel %vm754_vm2, %v700_v25, %v770_v28  ;;  %vm752_vm3 = vcmp.gt.f32.partialorder %v692_v29, 0.0  ;;  %v768_v32 = vmul.f32 0.01, %v692_v29  ;;  %v713_v33 = vadd.f32 %v1265_v30, %v1905_v16 }
 0x242   : > { %802 = vst [vmem:[#allocation2 + $0x18] sm:$0xff] %v786_v31  ;;  %v704_v34 = vpop.f32.mrf.mxu1 }
 0x243   : > { %v784_v35 = vsel %vm752_vm3, %v692_v29, %v768_v32  ;;  %vm757_vm4 = vcmp.gt.f32.partialorder %v713_v33, 0.0  ;;  %v773_v36 = vmul.f32 0.01, %v713_v33  ;;  %v705_v37 = vadd.f32 %v1905_v16, %v704_v34 }
 0x244   : > { %800 = vst [vmem:[#allocation2] sm:$0xff] %v784_v35  ;;  %v1266_v38 = vpop.f32.mrf.mxu1 }
 0x245   : > { %v789_v39 = vsel %vm757_vm4, %v713_v33, %v773_v36  ;;  %vm755_vm5 = vcmp.gt.f32.partialorder %v705_v37, 0.0  ;;  %v771_v40 = vmul.f32 0.01, %v705_v37  ;;  %v716_v41 = vadd.f32 %v1266_v38, %v1905_v16 }
 0x246   : > { %805 = vst [vmem:[#allocation2 + $0x8] sm:$0xff] %v789_v39  ;;  %v707_v42 = vpop.f32.mrf.mxu1 }
 0x247   : > { %v787_v43 = vsel %vm755_vm5, %v705_v37, %v771_v40  ;;  %vm758_vm6 = vcmp.gt.f32.partialorder %v716_v41, 0.0  ;;  %v774_v44 = vmul.f32 0.01, %v716_v41  ;;  %v708_v45 = vadd.f32 %v1905_v16, %v707_v42 }
 0x248   : > { %803 = vst [vmem:[#allocation2 + $0x50] sm:$0xff] %v787_v43  ;;  %v1269_v46 = vpop.f32.mrf.mxu1 }
 0x249   : > { %v790_v47 = vsel %vm758_vm6, %v716_v41, %v774_v44  ;;  %vm756_vm7 = vcmp.gt.f32.partialorder %v708_v45, 0.0  ;;  %v772_v48 = vmul.f32 0.01, %v708_v45  ;;  %v729_v49 = vadd.f32 %v1269_v46, %v1905_v16 }
 0x24a   : > { %806 = vst [vmem:[#allocation2 + $0x48] sm:$0xff] %v790_v47  ;;  %v720_v50 = vpop.f32.mrf.mxu1 }
 0x24b   : > { %v788_v51 = vsel %vm756_vm7, %v708_v45, %v772_v48  ;;  %vm761_vm8 = vcmp.gt.f32.partialorder %v729_v49, 0.0  ;;  %v777_v52 = vmul.f32 0.01, %v729_v49  ;;  %v721_v53 = vadd.f32 %v1905_v16, %v720_v50 }
 0x24c   : > { %804 = vst [vmem:[#allocation2 + $0x68] sm:$0xff] %v788_v51  ;;  %v1270_v54 = vpop.f32.mrf.mxu1 }
 0x24d   : > { %v793_v55 = vsel %vm761_vm8, %v729_v49, %v777_v52  ;;  %vm759_vm9 = vcmp.gt.f32.partialorder %v721_v53, 0.0  ;;  %v775_v56 = vmul.f32 0.01, %v721_v53  ;;  %v732_v57 = vadd.f32 %v1270_v54, %v1905_v16 }
 0x24e   : > { %809 = vst [vmem:[#allocation2 + $0x10] sm:$0xff] %v793_v55  ;;  %v723_v58 = vpop.f32.mrf.mxu1 }
 0x24f   : > { %v791_v59 = vsel %vm759_vm9, %v721_v53, %v775_v56  ;;  %vm762_vm10 = vcmp.gt.f32.partialorder %v732_v57, 0.0  ;;  %v778_v60 = vmul.f32 0.01, %v732_v57  ;;  %v724_v61 = vadd.f32 %v1905_v16, %v723_v58 }
 0x250   : > { %807 = vst [vmem:[#allocation2 + $0x40] sm:$0xff] %v791_v59  ;;  %v1273_v62 = vpop.f32.mrf.mxu1 }
 0x251   : > { %v794_v63 = vsel %vm762_vm10, %v732_v57, %v778_v60  ;;  %vm760_vm11 = vcmp.gt.f32.partialorder %v724_v61, 0.0  ;;  %v776_v0 = vmul.f32 0.01, %v724_v61  ;;  %v745_v1 = vadd.f32 %v1273_v62, %v1905_v16 }
 0x252   : > { %810 = vst [vmem:[#allocation2 + $0x38] sm:$0xff] %v794_v63  ;;  %v736_v2 = vpop.f32.mrf.mxu1 }
 0x253   : > { %v792_v3 = vsel %vm760_vm11, %v724_v61, %v776_v0  ;;  %vm765_vm12 = vcmp.gt.f32.partialorder %v745_v1, 0.0  ;;  %v781_v4 = vmul.f32 0.01, %v745_v1  ;;  %v737_v5 = vadd.f32 %v1905_v16, %v736_v2 }
 0x254   : > { %808 = vst [vmem:[#allocation2 + $0x20] sm:$0xff] %v792_v3  ;;  %v1274_v6 = vpop.f32.mrf.mxu1 }
 0x255   : > { %v797_v7 = vsel %vm765_vm12, %v745_v1, %v781_v4  ;;  %vm763_vm13 = vcmp.gt.f32.partialorder %v737_v5, 0.0  ;;  %v779_v8 = vmul.f32 0.01, %v737_v5  ;;  %v748_v9 = vadd.f32 %v1274_v6, %v1905_v16 }
 0x256   : > { %813 = vst [vmem:[#allocation2 + $0x78] sm:$0xff] %v797_v7  ;;  %v739_v10 = vpop.f32.mrf.mxu1 }
 0x257   : > { %v795_v11 = vsel %vm763_vm13, %v737_v5, %v779_v8  ;;  %vm766_vm14 = vcmp.gt.f32.partialorder %v748_v9, 0.0  ;;  %v782_v12 = vmul.f32 0.01, %v748_v9  ;;  %v740_v13 = vadd.f32 %v1905_v16, %v739_v10 }
 0x258   : > { %811 = vst [vmem:[#allocation2 + $0x60] sm:$0xff] %v795_v11  ;;  %818 = sbr.rel (%p1138_p10) target bundleno = 1030 (0x406), region = 76 }
 0x259   : > { %v798_v14 = vsel %vm766_vm14, %v748_v9, %v782_v12  ;;  %vm764_vm15 = vcmp.gt.f32.partialorder %v740_v13, 0.0  ;;  %v780_v15 = vmul.f32 0.01, %v740_v13 }
 0x25a   : > { %814 = vst [vmem:[#allocation2 + $0x28] sm:$0xff] %v798_v14 }
 0x25b   : > { %v796_v17 = vsel %vm764_vm15, %v740_v13, %v780_v15 }
 0x25c   : > { %812 = vst [vmem:[#allocation2 + $0x70] sm:$0xff] %v796_v17 }
 0x25d   : > { %v1675_v19 = vmov 0.0   ;;  %v834_v20 = vld [vmem:[#allocation2 + $0x78] sm:$0xff]  ;;  %vm1676_vm0 = vmmov 0   ;;  %v921_v22 = vld [vmem:[#allocation10 + $0x78] sm:$0xff]  ;;  %v919_v25 = vld [vmem:[#allocation10 + $0x68] sm:$0xff] }
 0x25e   : > { %1275 = vmatprep.subr.mxu0 %v1675_v19  ;;  %1307 = vmatprep.mubr.msk.f32.mxu0 %vm1676_vm0, %v1675_v19  ;;  %v920_v23 = vld [vmem:[#allocation10 + $0x70] sm:$0xff]  ;;  %v830_v26 = vld [vmem:[#allocation2 + $0x10] sm:$0xff]  ;;  %v918_v27 = vld [vmem:[#allocation10 + $0x60] sm:$0xff] }
 0x25f   : > { %1310 = vmatprep.subr.mxu1 %v1675_v19  ;;  %1342 = vmatprep.mubr.msk.f32.mxu1 %vm1676_vm0, %v1675_v19  ;;  %v832_v21 = vld [vmem:[#allocation2 + $0x60] sm:$0xff]  ;;  %v831_v24 = vld [vmem:[#allocation2 + $0x38] sm:$0xff]  ;;  %v827_v32 = vld [vmem:[#allocation2 + $0x48] sm:$0xff] }
 0x260   : > { %1311 = vmatpush3.msra.mxu1 %v921_v22  ;;  %v829_v28 = vld [vmem:[#allocation2 + $0x20] sm:$0xff]  ;;  %v916_v31 = vld [vmem:[#allocation10 + $0x50] sm:$0xff]  ;;  %v915_v33 = vld [vmem:[#allocation10 + $0x48] sm:$0xff] }
 0x261   : > { %v835_v18 = vld [vmem:[#allocation2 + $0x28] sm:$0xff]  ;;  %1312 = vmatprep.subr.mxu1 %v1675_v19  ;;  %v917_v29 = vld [vmem:[#allocation10 + $0x58] sm:$0xff]  ;;  %v824_v38 = vld [vmem:[#allocation2 + $0x50] sm:$0xff] }
 0x262   : > { %1276 = vmatpush3.msra.mxu0 %v835_v18  ;;  %1313 = vmatpush3.msra.mxu1 %v920_v23  ;;  %v828_v30 = vld [vmem:[#allocation2 + $0x40] sm:$0xff]  ;;  %v826_v34 = vld [vmem:[#allocation2 + $0x8] sm:$0xff]  ;;  %v912_v39 = vld [vmem:[#allocation10 + $0x30] sm:$0xff] }
 0x263   : > { %1277 = vmatprep.subr.mxu0 %v1675_v19  ;;  %v833_v16 = vld [vmem:[#allocation2 + $0x70] sm:$0xff]  ;;  %1314 = vmatprep.subr.mxu1 %v1675_v19  ;;  %v914_v35 = vld [vmem:[#allocation10 + $0x40] sm:$0xff]  ;;  %v913_v37 = vld [vmem:[#allocation10 + $0x38] sm:$0xff] }
 0x264   : > { %1278 = vmatpush3.msra.mxu0 %v834_v20  ;;  %1315 = vmatpush3.msra.mxu1 %v919_v25  ;;  %v825_v36 = vld [vmem:[#allocation2 + $0x68] sm:$0xff]  ;;  %v823_v40 = vld [vmem:[#allocation2 + $0x18] sm:$0xff]  ;;  %v911_v41 = vld [vmem:[#allocation10 + $0x28] sm:$0xff] }
 0x265   : > { %1279 = vmatprep.subr.mxu0 %v1675_v19  ;;  %1316 = vmatprep.subr.mxu1 %v1675_v19  ;;  %v822_v42 = vld [vmem:[#allocation2 + $0x58] sm:$0xff]  ;;  %v910_v43 = vld [vmem:[#allocation10 + $0x20] sm:$0xff]  ;;  %v821_v44 = vld [vmem:[#allocation2] sm:$0xff] }
 0x266   : > { %1280 = vmatpush3.msra.mxu0 %v833_v16  ;;  %1317 = vmatpush3.msra.mxu1 %v918_v27  ;;  %v909_v45 = vld [vmem:[#allocation10 + $0x18] sm:$0xff]  ;;  %v820_v46 = vld [vmem:[#allocation2 + $0x30] sm:$0xff]  ;;  %v908_v47 = vld [vmem:[#allocation10 + $0x10] sm:$0xff] }
 0x267   : > { %1281 = vmatprep.subr.mxu0 %v1675_v19  ;;  %1318 = vmatprep.subr.mxu1 %v1675_v19  ;;  %v819_v48 = vld [vmem:[#allocation9] sm:$0xff]  ;;  %v907_v49 = vld [vmem:[#allocation10 + $0x8] sm:$0xff]  ;;  %v906_v50 = vld [vmem:[#allocation10] sm:$0xff] }
 0x268   : > { %1282 = vmatpush3.msra.mxu0 %v832_v21  ;;  %1319 = vmatpush3.msra.mxu1 %v917_v29  ;;  %v1139_v53 = vld [vmem:[%s1992_s6] ss:$0 sm:$0xff] }
 0x269   : > { %1283 = vmatprep.subr.mxu0 %v1675_v19  ;;  %1320 = vmatprep.subr.mxu1 %v1675_v19 }
 0x26a   : > { %1284 = vmatpush3.msra.mxu0 %v831_v24  ;;  %1321 = vmatpush3.msra.mxu1 %v916_v31 }
 0x26b   : > { %1285 = vmatprep.subr.mxu0 %v1675_v19  ;;  %1322 = vmatprep.subr.mxu1 %v1675_v19 }
 0x26c   : > { %1286 = vmatpush3.msra.mxu0 %v830_v26  ;;  %1323 = vmatpush3.msra.mxu1 %v915_v33 }
 0x26d   : > { %1287 = vmatprep.subr.mxu0 %v1675_v19  ;;  %1324 = vmatprep.subr.mxu1 %v1675_v19 }
 0x26e   : > { %1288 = vmatpush3.msra.mxu0 %v829_v28  ;;  %1325 = vmatpush3.msra.mxu1 %v914_v35 }
 0x26f   : > { %1289 = vmatprep.subr.mxu0 %v1675_v19  ;;  %1326 = vmatprep.subr.mxu1 %v1675_v19 }
 0x270   : > { %1290 = vmatpush3.msra.mxu0 %v828_v30  ;;  %1327 = vmatpush3.msra.mxu1 %v913_v37 }
 0x271   : > { %1291 = vmatprep.subr.mxu0 %v1675_v19  ;;  %1328 = vmatprep.subr.mxu1 %v1675_v19 }
 0x272   : > { %1292 = vmatpush3.msra.mxu0 %v827_v32  ;;  %1329 = vmatpush3.msra.mxu1 %v912_v39 }
 0x273   : > { %1293 = vmatprep.subr.mxu0 %v1675_v19  ;;  %1330 = vmatprep.subr.mxu1 %v1675_v19 }
 0x274   : > { %1294 = vmatpush3.msra.mxu0 %v826_v34  ;;  %1331 = vmatpush3.msra.mxu1 %v911_v41 }
 0x275   : > { %1295 = vmatprep.subr.mxu0 %v1675_v19  ;;  %1332 = vmatprep.subr.mxu1 %v1675_v19 }
 0x276   : > { %1296 = vmatpush3.msra.mxu0 %v825_v36  ;;  %1333 = vmatpush3.msra.mxu1 %v910_v43 }
 0x277   : > { %1297 = vmatprep.subr.mxu0 %v1675_v19  ;;  %1334 = vmatprep.subr.mxu1 %v1675_v19 }
 0x278   : > { %1298 = vmatpush3.msra.mxu0 %v824_v38  ;;  %1335 = vmatpush3.msra.mxu1 %v909_v45 }
 0x279   : > { %1299 = vmatprep.subr.mxu0 %v1675_v19  ;;  %1336 = vmatprep.subr.mxu1 %v1675_v19 }
 0x27a   : > { %1300 = vmatpush3.msra.mxu0 %v823_v40  ;;  %1337 = vmatpush3.msra.mxu1 %v908_v47 }
 0x27b   : > { %1301 = vmatprep.subr.mxu0 %v1675_v19  ;;  %1338 = vmatprep.subr.mxu1 %v1675_v19 }
 0x27c   : > { %1302 = vmatpush3.msra.mxu0 %v822_v42  ;;  %1339 = vmatpush3.msra.mxu1 %v907_v49 }
 0x27d   : > { %1303 = vmatprep.subr.mxu0 %v1675_v19  ;;  %1340 = vmatprep.subr.mxu1 %v1675_v19 }
 0x27e   : > { %1304 = vmatpush3.msra.mxu0 %v821_v44  ;;  %1341 = vmatpush3.msra.mxu1 %v906_v50 }
 0x27f   : > { %1305 = vmatprep.subr.mxu0 %v1675_v19 }
 0x280   : > { %1306 = vmatpush3.msra.mxu0 %v820_v46 }
 0x281   : > { %1308 = vmatmul.mubr.f32.vlgmr.msra.gmra.mxu0 %v819_v48 }
 0x341   : > { %v902_v51 = vpop.f32.mrf.mxu0 }
 0x342   : > { %1343 = vmatmul.mubr.f32.vlgmr.msra.gmra.mxu1 %v902_v51 }
 0x343   : > { %v1309_v52 = vpop.f32.mrf.mxu0 }
 0x402   : > { %v995_v54 = vpop.f32.mrf.mxu1 }
 0x403   : > { %v996_v55 = vadd.f32 %v1139_v53, %v995_v54 }
 0x404   : > { %v1344_v56 = vpop.f32.mrf.mxu1 }
 0x405   : > { %999 = vst [vmem:[#allocation12] sm:$0xff] %v996_v55 }
 0x406 PF: > { %p1393_p12 = scmp.eq.s32.totalorder %s1737_s28, 2  ;;  %s1677_s12 = smov [#allocation12]  }
 0x407   : > { %s1007_s24 = sshll.u32 %s1677_s12, 4  ;;  %s1008_s24 = int_to_ptr.vmem [resolvable:$true] %s1007_s24 }
 0x408   : > { %s1586_s13 = scalar_lea.vmem %s1008_s24, 128  ;;  %p1593_p2 = scmp.lt.s32.totalorder %s1008_s24, %s1008_s24 }
 0x409   : > { %p1587_p11 = scmp.ne.s32.totalorder %s1008_s24, %s1586_s13  ;;  %p1594_p3 = scmp.lt.s32.totalorder %s1586_s13, %s1586_s13 }
 0x40b   : > { %p1588_p13 = pnand %p1587_p11, %p1393_p12  ;;  %p1595_p8 = por %p1594_p3, %p1593_p2 }
 0x40d   : > { %p1589_p0 = pneg %p1588_p13 }
 0x40f   : > { %p1596_p7 = pnand %p1595_p8, %p1589_p0 }
 0x411   : > { %1599 = shalt.err (!%p1596_p7)
}
 0x412   : > { %1364 = dma.vmem_to_hbm [thread:$0]  (%p1393_p12), %s1008_s24, 128, %s1993_s7, [#allocation5]  }
 0x413   : > { %1647 = dma.done.wait (%p1393_p12), [#allocation5], 128  }
 0x414   : > { %1649 = vsyncadd (%p1393_p12), [#allocation5], 4294967168 }
 0x415 PF: > { %p18_p1 = scmp.ge.s32.totalorder %s1806_s21, 5   ;;  %s2012_s24 = smov %s1656_s25 }
 0x416   : > { %s2013_s25 = smov %s1660_s26  ;;  %s2014_s26 = smov %s1815_s23 }
 0x417   : > { %s2015_s27 = smov %s1806_s21  ;;  %20 = sbr.rel (!%p18_p1) target bundleno = 5 (0x5), region = 111 }
 0x41c   :  { %1020 = vsyncpa [#allocation4], 1 }
 0x41d   :  { %1022 = vsyncpa [#allocation4 + $0x1], 1 }
 0x41e   :  { %1023 = vsyncpa [#allocation7], 1 }
 0x41f   :  { %1024 = vsyncpa [#allocation11], 1 }
 0x420   :  { %1025 = vsyncpa [#allocation5], 1 }
 0x421   :  { %1027 = vsyncpa [#allocation5 + $0x1], 1 }

</bundles_post_ra>
